<compile_context>
chip_gen: v6e
topology: v6e:2x2x1
jax: 0.10.0
libtpu: 0.0.40
codegen_flags: <defaults>
</compile_context>

<pallas_src>
import jax
import jax.numpy as jnp
from jax.experimental import pallas as pl
from jax.experimental.pallas import tpu as pltpu


def conv1x1_bias_tanh_kernel(x_ref, w_ref, b_ref, o_ref):
    # x_ref: (C_in, TN)   activation tile, positions on the lane axis
    # w_ref: (C_out, C_in) resident weight
    # b_ref: (C_out, 1)    resident bias
    # o_ref: (C_out, TN)
    y = jnp.dot(w_ref[...], x_ref[...], preferred_element_type=jnp.float32)
    y = y + b_ref[...]            # VPU add, co-issues for free
    o_ref[...] = jnp.tanh(y).astype(o_ref.dtype)  # EUP epilogue, f32


def _pick_tile_n(L, max_tile_n=8192):
    # Largest lane-dense (multiple-of-128) divisor of L, capped at max_tile_n.
    # Falls back to TN = L (single tile) when L is not a multiple of 128.
    for cand in (max_tile_n, 4096, 2048, 1024, 512, 256, 128):
        if cand <= L and L % cand == 0 and cand % 128 == 0:
            return cand
    return L


def conv1x1_tanh(x, w, b):
    """x: (B, C_in, L) NCL; w: (C_out, C_in); b: (C_out,) -> (B, C_out, L) NCL."""
    B, C_in, L = x.shape
    C_out = w.shape[0]
    TN = _pick_tile_n(L)
    grid = (B, L // TN)

    # Tiny (C_out, 1) bias block; in a real model this would be prepared once at
    # parameter-prep time rather than per call (56 bytes here, negligible).
    b2d = b.reshape(C_out, 1).astype(w.dtype)

    return pl.pallas_call(
        conv1x1_bias_tanh_kernel,
        out_shape=jax.ShapeDtypeStruct((B, C_out, L), x.dtype),
        grid_spec=pltpu.PrefetchScalarGridSpec(
            num_scalar_prefetch=0,
            grid=grid,
            in_specs=[
                # Read NCL directly: batch dim squeezed, L tiled on the lane axis.
                pl.BlockSpec((None, C_in, TN), lambda bi, ni: (bi, 0, ni)),
                # Weight and bias stay resident across the whole grid.
                pl.BlockSpec((C_out, C_in), lambda bi, ni: (0, 0)),
                pl.BlockSpec((C_out, 1), lambda bi, ni: (0, 0)),
            ],
            out_specs=pl.BlockSpec((None, C_out, TN), lambda bi, ni: (bi, 0, ni)),
        ),
        compiler_params=pltpu.CompilerParams(
            # Both grid axes are independent -> shard across v7x's 2 TensorCores.
            dimension_semantics=("parallel", "parallel"),
        ),
    )(x, w, b2d)


def reference(x, w, b):
    y = jnp.einsum("oc,bcl->bol", w, x) + b[None, :, None]
    return jnp.tanh(y)


if __name__ == "__main__":
    key = jax.random.PRNGKey(0)
    kx, kw, kb, kx2 = jax.random.split(key, 4)

    # Shapes implied by the module: x2 = torch.randn(1, 14, 64)
    B, C, L = 1, 14, 64
    x2 = jax.random.normal(kx, (B, C, L), dtype=jnp.float32)

    # Deterministic init matching Conv1d(14, 14, 1, bias=True):
    # weight (C_out, C_in, 1) -> kernel dim squeezed; bias (C_out,)
    fan_in = C * 1
    bound = 1.0 / (fan_in ** 0.5)
    w = jax.random.uniform(kw, (C, C), minval=-bound, maxval=bound, dtype=jnp.float32)
    b = jax.random.uniform(kb, (C,), minval=-bound, maxval=bound, dtype=jnp.float32)

    out = jax.block_until_ready(conv1x1_tanh(x2, w, b))
    ref = reference(x2, w, b)
    assert out.shape == (B, C, L)
    assert jnp.allclose(out, ref, atol=1e-5, rtol=1e-5)

    # Second check: real batch + lane-dense L exercises the (B, L/TN) grid path.
    B2, L2 = 2, 256
    xb = jax.random.normal(kx2, (B2, C, L2), dtype=jnp.float32)
    outb = jax.block_until_ready(conv1x1_tanh(xb, w, b))
    refb = reference(xb, w, b)
    assert outb.shape == (B2, C, L2)
    assert jnp.allclose(outb, refb, atol=1e-5, rtol=1e-5)

    print("KERNEL_OK")
</pallas_src>

<mosaic_0001>
module attributes {stable_mosaic.version = 11 : i64} {
  func.func @conv1x1_bias_tanh_kernel(%arg0: i32, %arg1: i32, %arg2: memref<1x14x64xf32, #tpu.memory_space<vmem>>, %arg3: memref<14x14xf32, #tpu.memory_space<vmem>>, %arg4: memref<14x1xf32, #tpu.memory_space<vmem>>, %arg5: memref<1x14x64xf32, #tpu.memory_space<vmem>>) attributes {dimension_semantics = [#tpu.dimension_semantics<parallel>, #tpu.dimension_semantics<parallel>], iteration_bounds = array<i64: 1, 1>, scalar_prefetch = 0 : i64, scratch_operands = 0 : i64, tpu.core_type = #tpu.core_type<tc>, window_params = [{transform_indices = @transform_0, window_bounds = array<i64: 1, 14, 64>}, {pipeline_mode = #tpu.pipeline_mode<synchronous>, transform_indices = @transform_1, window_bounds = array<i64: 14, 14>}, {pipeline_mode = #tpu.pipeline_mode<synchronous>, transform_indices = @transform_2, window_bounds = array<i64: 14, 1>}, {transform_indices = @transform_3, window_bounds = array<i64: 1, 14, 64>}]} {
    %c0 = arith.constant 0 : index
    %c0_0 = arith.constant 0 : index
    %0 = vector.load %arg3[%c0, %c0_0] : memref<14x14xf32, #tpu.memory_space<vmem>>, vector<14x14xf32>
    %c0_1 = arith.constant 0 : index
    %c0_2 = arith.constant 0 : index
    %c0_3 = arith.constant 0 : index
    %1 = vector.load %arg2[%c0_1, %c0_2, %c0_3] : memref<1x14x64xf32, #tpu.memory_space<vmem>>, vector<1x14x64xf32>
    %2 = vector.shape_cast %1 : vector<1x14x64xf32> to vector<14x64xf32>
    %cst = arith.constant dense<0.000000e+00> : vector<14x64xf32>
    %3 = tpu.matmul %0, %2, %cst {dimension_numbers = #tpu.dot_dimension_numbers<[1], [0], [0], [1], [0, 0, 1, 1], [], []>} : vector<14x14xf32>, vector<14x64xf32>, vector<14x64xf32> -> vector<14x64xf32>
    %c0_4 = arith.constant 0 : index
    %c0_5 = arith.constant 0 : index
    %4 = vector.load %arg4[%c0_4, %c0_5] : memref<14x1xf32, #tpu.memory_space<vmem>>, vector<14x1xf32>
    %5 = vector.broadcast %4 : vector<14x1xf32> to vector<14x64xf32>
    %6 = arith.addf %3, %5 : vector<14x64xf32>
    %7 = math.tanh %6 : vector<14x64xf32>
    %c0_6 = arith.constant 0 : index
    %c0_7 = arith.constant 0 : index
    %c0_8 = arith.constant 0 : index
    %8 = vector.load %arg5[%c0_6, %c0_7, %c0_8] : memref<1x14x64xf32, #tpu.memory_space<vmem>>, vector<1x14x64xf32>
    %9 = vector.shape_cast %8 : vector<1x14x64xf32> to vector<14x64xf32>
    %10 = vector.shape_cast %7 : vector<14x64xf32> to vector<1x14x64xf32>
    tpu.vector_store %arg5[%c0_6, %c0_7, %c0_8], %10 {strides = array<i32>} : memref<1x14x64xf32, #tpu.memory_space<vmem>>, vector<1x14x64xf32>,
    return
  }
  func.func @transform_0(%arg0: i32, %arg1: i32) -> (i32, i32, i32) {
    %c0_i32 = arith.constant 0 : i32
    %c0_i32_0 = arith.constant 0 : i32
    return %arg0, %c0_i32, %arg1 : i32, i32, i32
  }
  func.func @transform_1(%arg0: i32, %arg1: i32) -> (i32, i32) {
    %c0_i32 = arith.constant 0 : i32
    %c0_i32_0 = arith.constant 0 : i32
    %c0_i32_1 = arith.constant 0 : i32
    return %c0_i32, %c0_i32_0 : i32, i32
  }
  func.func @transform_2(%arg0: i32, %arg1: i32) -> (i32, i32) {
    %c0_i32 = arith.constant 0 : i32
    %c0_i32_0 = arith.constant 0 : i32
    %c0_i32_1 = arith.constant 0 : i32
    return %c0_i32, %c0_i32_0 : i32, i32
  }
  func.func @transform_3(%arg0: i32, %arg1: i32) -> (i32, i32, i32) {
    %c0_i32 = arith.constant 0 : i32
    %c0_i32_0 = arith.constant 0 : i32
    return %arg0, %c0_i32, %arg1 : i32, i32, i32
  }
}

</mosaic_0001>

<bundles_post_ra>
// kernel: tpu_custom_call.1
= control target key start
LH: loop header
LB: loop body
LE: loop exit
PB: predicated region body
PF: predicated region fallthrough
CT: control target
= control target key end

     0   :  { %vm37_vm0 = vcmask 1045504   ;;  %vm30_vm1 = vcmask 113664   ;;  %v146_v3 = vmov 0   ;;  %vm120_vm2 = vcmask 521216   ;;  %s193_s0 = inlined_call_operand.vmem [shape: f32[1,14,64], index: 0, kind: input, shape index: {}]   ;;  %s194_s1 = inlined_call_operand.vmem [shape: f32[14,14], index: 1, kind: input, shape index: {}]   ;;  %s195_s2 = inlined_call_operand.vmem [shape: f32[14,1], index: 2, kind: input, shape index: {}]   ;;  %s196_s3 = inlined_call_operand.vmem [shape: f32[1,14,64], index: 3, kind: output, shape index: {}]  }
   0x1   :  { %v17_v0 = vld [vmem:[%s193_s0 + $0x8] sm:$0x3f]  ;;  %v16_v1 = vld [vmem:[%s193_s0] sm:$0xff]  ;;  %141 = vset.pattern.permute.xlu0 %v146_v3  ;;  %vm118_vm3 = vcmask 523264  }
   0x2   :  { %v14_v2 = vld [vmem:[%s194_s1] sm:$0xff]  ;;  %133 = vmatprep.subr.msk.mxu0 %vm37_vm0, %v17_v0  ;;  %v15_v5 = vld [vmem:[%s194_s1 + $0x8] sm:$0x3f] }
   0x3   :  { %137 = vmatprep.mubr.msk.f32.mxu0 %vm30_vm1, %v14_v2  ;;  %v18_v4 = vld [vmem:[%s195_s2] sm:$0xff]  ;;  %134 = vmatpush3.msk.msra.mxu0 %vm37_vm0, %v17_v0  ;;  %v19_v6 = vld [vmem:[%s195_s2 + $0x8] sm:$0x3f] }
   0x4   :  { %22 = vperm.xlu0 %141, %v18_v4   ;;  %135 = vmatprep.subr.mxu0 %v16_v1 }
   0x5   :  { %136 = vmatpush3.msra.mxu0 %v16_v1 }
   0x6   :  { %138 = vmatmul.mubr.msk.f32.vlgmr.msra.gmra.mxu0 %vm30_vm1, %v15_v5 }
   0x8   :  { %27 = vperm.xlu0 %141, %v19_v6  }
  0x7f   :  { %v23_v7 = vpop.permute.xlu0 %22 }
  0x83   :  { %v28_v8 = vpop.permute.xlu0 %27 }
  0xc6   :  { %v139_v9 = vpop.f32.mrf.mxu0 }
  0xc7   :  { %v113_v10 = vadd.f32 %v139_v9, %v28_v8 }
  0xc8   :  { %v107_v11 = vpop.f32.mrf.mxu0 }
  0xc9   :  { %142 = vtanh.f32 %v113_v10  ;;  %v108_v12 = vadd.f32 %v107_v11, %v23_v7 }
  0xcb   :  { %144 = vtanh.f32 %v108_v12 }
  0xd6   :  { %v143_v13 = vpop.eup %142 }
  0xd7   :  { %121 = vst.msk [vmem:[%s196_s3 + $0x8] sm:$0x3f] %vm120_vm2, %v143_v13 }
  0xd8   :  { %v145_v14 = vpop.eup %144 }
  0xd9   :  { %119 = vst.msk [vmem:[%s196_s3] sm:$0xff] %vm118_vm3, %v145_v14 }

</bundles_post_ra>
